<compile_context>
chip_gen: v6e
topology: v6e:2x2x1
jax: 0.10.0
libtpu: 0.0.40
codegen_flags: <defaults>
</compile_context>

<pallas_src>
from functools import partial

import numpy as np
import jax
import jax.numpy as jnp
from jax.experimental import pallas as pl
from jax.experimental.pallas import tpu as pltpu

LANE = 128      # vreg lane width
SUBLANE = 8     # vreg sublane count (f32)
MAX_TILE_N = 1024


# ----------------------------------------------------------------------------
# Parameter construction (deterministic, mirrors position_encoding in PyTorch)
# ----------------------------------------------------------------------------
def position_encoding(periods: int, freqs: int) -> np.ndarray:
    sin_part = np.fromfunction(
        lambda i, j: np.sin(np.pi / periods * 2.0 ** j * (i - 1)),
        (periods + 1, freqs),
    )
    cos_part = np.fromfunction(
        lambda i, j: np.cos(np.pi / periods * 2.0 ** j * (i - 1)),
        (periods + 1, freqs),
    )
    return np.hstack([sin_part, cos_part])  # (periods+1, 2*freqs)


def _round_up(x: int, m: int) -> int:
    return -(-x // m) * m


# ----------------------------------------------------------------------------
# Pallas kernel: transposed one-hot gather
#   outT[:, n] = embT[:, ids[n]]   via   embT(Cp,P1p) @ onehotT(P1p,TN)
# ----------------------------------------------------------------------------
def _gather_kernel(ids_ref, embT_ref, outT_ref):
    # ids_ref : (1, TN)   int32   (lane-dense id tile)
    # embT_ref: (Cp, P1p) f32     (table, transposed & padded, VMEM-resident)
    # outT_ref: (Cp, TN)  f32     (lane-dense output tile)
    ids = ids_ref[...]                                            # (1, TN)
    p1p = embT_ref.shape[1]
    tn = ids.shape[1]
    row_ids = jax.lax.broadcasted_iota(jnp.int32, (p1p, tn), 0)   # (P1p, TN)
    onehot_t = (row_ids == ids).astype(embT_ref.dtype)            # (P1p, TN)
    outT_ref[...] = jnp.dot(
        embT_ref[...], onehot_t, preferred_element_type=jnp.float32
    ).astype(outT_ref.dtype)


def _gather_pallas(ids_2d: jax.Array, embT: jax.Array, tile_n: int) -> jax.Array:
    """ids_2d: (1, N) int32, N multiple of tile_n. embT: (Cp, P1p) f32.
    Returns (Cp, N) f32 with column n = embT[:, ids[n]]."""
    _, n_pad = ids_2d.shape
    c_pad, p1_pad = embT.shape
    grid = (n_pad // tile_n,)
    return pl.pallas_call(
        _gather_kernel,
        out_shape=jax.ShapeDtypeStruct((c_pad, n_pad), jnp.float32),
        grid_spec=pltpu.PrefetchScalarGridSpec(
            num_scalar_prefetch=0,
            grid=grid,
            in_specs=[
                pl.BlockSpec((1, tile_n), lambda i: (0, i)),        # ids tile (lane-dense)
                pl.BlockSpec((c_pad, p1_pad), lambda i: (0, 0)),    # resident padded table
            ],
            out_specs=pl.BlockSpec((c_pad, tile_n), lambda i: (0, i)),
        ),
        compiler_params=pltpu.CompilerParams(
            dimension_semantics=("parallel",),
        ),
    )(ids_2d, embT)


# ----------------------------------------------------------------------------
# Fused device-side forward (single jitted executable: cast/pad/kernel/epilogue)
# ----------------------------------------------------------------------------
@partial(jax.jit, static_argnames=("tile_n", "channels"))
def _position_expand(tc, embT, *, tile_n: int, channels: int):
    b, s = tc.shape
    n = b * s
    # .to(torch.long) semantics: truncate toward zero for any numeric input.
    flat = tc.reshape(-1).astype(jnp.int32)
    n_pad = _round_up(n, tile_n)
    if n_pad != n:
        flat = jnp.pad(flat, (0, n_pad - n))        # padded ids=0, sliced off below
    ids_2d = flat.reshape(1, n_pad)
    outT = _gather_pallas(ids_2d, embT, tile_n)     # (Cp, n_pad)
    out = outT[:channels, :n].T                     # (n, C) — small fused epilogue
    return out.reshape(b, s, channels)


# ----------------------------------------------------------------------------
# Module-equivalent wrapper
# ----------------------------------------------------------------------------
class PositionExpansion:
    def __init__(self, periods: int, freqs: int):
        self.periods = periods
        self.channels = freqs * 2
        emb64 = position_encoding(periods, freqs)                 # (P1, C) float64
        # NOTE: PyTorch keeps this as float64; TPU compute uses float32 here.
        self.embedding = jnp.asarray(emb64, dtype=jnp.float32)    # (P1, C)

        # Transposed + padded table built once at init (zero-padded rows/cols).
        c_pad = _round_up(self.channels, SUBLANE)
        p1_pad = _round_up(periods + 1, LANE)
        embT = np.zeros((c_pad, p1_pad), dtype=np.float32)
        embT[: self.channels, : periods + 1] = emb64.T.astype(np.float32)
        self._embT = jnp.asarray(embT)
        self._c_pad = c_pad
        self._p1_pad = p1_pad

    def _tile_plan(self, n: int) -> int:
        """Pick tile_n: multiple of 128, capped by a VMEM budget, with >=2 grid
        steps whenever there is enough work (v7x megacore)."""
        # ~24 MiB working budget: safe under the 32 MiB scoped default on
        # v6e/v7x; small-C configs also fit the 16 MiB default on v5e.
        budget = 24 * 1024 * 1024
        table_bytes = 2 * self._c_pad * self._p1_pad * 4          # double-buffered
        # per output column: double-buffered out tile + ids + one-hot column
        per_col = 2 * (self._c_pad * 4 + 4) + self._p1_pad * 4
        vmem_tile = max(LANE, ((budget - table_bytes) // per_col) // LANE * LANE)
        max_tile = min(MAX_TILE_N, vmem_tile)

        n128 = _round_up(n, LANE)
        if n128 <= max_tile:
            if n128 >= 2 * LANE:
                # two tiles -> both v7x TensorCores busy
                return _round_up(n128, 2 * LANE) // 2
            return n128
        return max_tile

    def __call__(self, tc: jax.Array) -> jax.Array:
        b, s = tc.shape
        tile_n = self._tile_plan(b * s)
        return _position_expand(tc, self._embT, tile_n=tile_n, channels=self.channels)


# ----------------------------------------------------------------------------
# Reference (plain JAX) for correctness check
# ----------------------------------------------------------------------------
def reference(tc, emb, channels):
    b, s = tc.shape
    flat = tc.reshape(-1).astype(jnp.int32)
    return emb[flat].reshape(b, s, channels)


if __name__ == "__main__":
    key = jax.random.PRNGKey(0)

    # Case 1: toy shape matching the module spec (single-tile path).
    periods, freqs = 16, 4              # embedding: (17, 8), channels = 8
    batch, seq = 2, 8                   # tc: (2, 8) integer position codes
    k1, k2 = jax.random.split(key)
    tc = jax.random.randint(k1, (batch, seq), 0, periods + 1, dtype=jnp.int32)

    mod = PositionExpansion(periods, freqs)
    out = jax.block_until_ready(mod(tc))
    ref = reference(tc, mod.embedding, mod.channels)
    assert out.shape == (batch, seq, mod.channels), out.shape
    np.testing.assert_allclose(np.asarray(out), np.asarray(ref), rtol=1e-5, atol=1e-5)

    # Case 2: slightly larger input to exercise the multi-tile (grid >= 2) path.
    batch2, seq2 = 4, 96                # n = 384 -> padded to 512, 2 tiles of 256
    tc2 = jax.random.randint(k2, (batch2, seq2), 0, periods + 1, dtype=jnp.int32)
    out2 = jax.block_until_ready(mod(tc2))
    ref2 = reference(tc2, mod.embedding, mod.channels)
    assert out2.shape == (batch2, seq2, mod.channels), out2.shape
    np.testing.assert_allclose(np.asarray(out2), np.asarray(ref2), rtol=1e-5, atol=1e-5)

    print("KERNEL_OK")
</pallas_src>

<mosaic_0001>
module attributes {stable_mosaic.version = 11 : i64} {
  func.func @_gather_kernel(%arg0: i32, %arg1: memref<1x128xi32, #tpu.memory_space<vmem>>, %arg2: memref<8x128xf32, #tpu.memory_space<vmem>>, %arg3: memref<8x128xf32, #tpu.memory_space<vmem>>) attributes {dimension_semantics = [#tpu.dimension_semantics<parallel>], iteration_bounds = array<i64: 1>, scalar_prefetch = 0 : i64, scratch_operands = 0 : i64, tpu.core_type = #tpu.core_type<tc>, window_params = [{transform_indices = @transform_0, window_bounds = array<i64: 1, 128>}, {pipeline_mode = #tpu.pipeline_mode<synchronous>, transform_indices = @transform_1, window_bounds = array<i64: 8, 128>}, {transform_indices = @transform_2, window_bounds = array<i64: 8, 128>}]} {
    %c0 = arith.constant 0 : index
    %c0_0 = arith.constant 0 : index
    %0 = vector.load %arg1[%c0, %c0_0] : memref<1x128xi32, #tpu.memory_space<vmem>>, vector<1x128xi32>
    %1 = tpu.iota {dimensions = array<i32: 0>} : vector<128x128xi32>
    %2 = vector.broadcast %0 : vector<1x128xi32> to vector<128x128xi32>
    %3 = arith.cmpi eq, %1, %2 : vector<128x128xi32>
    %4 = arith.extui %3 : vector<128x128xi1> to vector<128x128xi32>
    %5 = arith.sitofp %4 : vector<128x128xi32> to vector<128x128xf32>
    %c0_1 = arith.constant 0 : index
    %c0_2 = arith.constant 0 : index
    %6 = vector.load %arg2[%c0_1, %c0_2] : memref<8x128xf32, #tpu.memory_space<vmem>>, vector<8x128xf32>
    %cst = arith.constant dense<0.000000e+00> : vector<8x128xf32>
    %7 = tpu.matmul %6, %5, %cst {dimension_numbers = #tpu.dot_dimension_numbers<[1], [0], [0], [1], [0, 0, 1, 1], [], []>} : vector<8x128xf32>, vector<128x128xf32>, vector<8x128xf32> -> vector<8x128xf32>
    %c0_3 = arith.constant 0 : index
    %c0_4 = arith.constant 0 : index
    %8 = vector.load %arg3[%c0_3, %c0_4] : memref<8x128xf32, #tpu.memory_space<vmem>>, vector<8x128xf32>
    tpu.vector_store %arg3[%c0_3, %c0_4], %7 {strides = array<i32>} : memref<8x128xf32, #tpu.memory_space<vmem>>, vector<8x128xf32>,
    return
  }
  func.func @transform_0(%arg0: i32) -> (i32, i32) {
    %c0_i32 = arith.constant 0 : i32
    %c0_i32_0 = arith.constant 0 : i32
    return %c0_i32, %arg0 : i32, i32
  }
  func.func @transform_1(%arg0: i32) -> (i32, i32) {
    %c0_i32 = arith.constant 0 : i32
    %c0_i32_0 = arith.constant 0 : i32
    %c0_i32_1 = arith.constant 0 : i32
    return %c0_i32, %c0_i32_0 : i32, i32
  }
  func.func @transform_2(%arg0: i32) -> (i32, i32) {
    %c0_i32 = arith.constant 0 : i32
    %c0_i32_0 = arith.constant 0 : i32
    return %c0_i32, %arg0 : i32, i32
  }
}

</mosaic_0001>

<bundles_post_ra>
// kernel: _position_expand.1
= control target key start
LH: loop header
LB: loop body
LE: loop exit
PB: predicated region body
PF: predicated region fallthrough
CT: control target
= control target key end

     0   :  { %7 = vsyncpa [#allocation3], 0  ;;  %s281_s9 = smov [#allocation2]   ;;  %s344_s0 = inlined_call_operand.vmem [shape: s32[1,128], index: 0, kind: input, shape index: {}]   ;;  %s345_s1 = inlined_call_operand.hbm [shape: f32[8,128], index: 1, kind: input, shape index: {}]   ;;  %s346_s2 = inlined_call_operand.vmem [shape: f32[8,128], index: 2, kind: output, shape index: {}]  }
   0x1   :  { %s16_s10 = sshll.u32 %s281_s9, 4  ;;  %s17_s10 = int_to_ptr.vmem [resolvable:$true] %s16_s10 }
   0x2   :  { %s267_s11 = scalar_lea.vmem %s17_s10, 128  ;;  %p272_p1 = scmp.lt.s32.totalorder %s17_s10, %s17_s10 }
   0x3   :  { %p268_p0 = scmp.ne.s32.totalorder %s17_s10, %s267_s11  ;;  %p273_p2 = scmp.lt.s32.totalorder %s267_s11, %s267_s11 }
   0x5   :  { %p274_p3 = por %p273_p2, %p272_p1 }
   0x7   :  { %p275_p4 = pnand %p274_p3, %p268_p0 }
   0x9   :  { %278 = shalt.err (!%p275_p4)
}
   0xa   :  { %19 = dma.hbm_to_vmem [thread:$0]  %s345_s1, 128, %s17_s10, [#allocation3]  }
   0xb   :  { %279 = dma.done.wait [#allocation3], 128  }
   0xc   :  { %280 = vsyncadd [#allocation3], 4294967168  ;;  %v24_v0 = vlaneseq  ;;  %v282_v1 = vmov 0.0   ;;  %vm283_vm0 = vmmov 0   ;;  %v170_v6 = vld [vmem:[%s344_s0] ss:$0 sm:$0xff] }
   0xd   :  { %220 = vmatprep.subr.mxu0 %v282_v1  ;;  %252 = vmatprep.mubr.msk.f32.mxu0 %vm283_vm0, %v282_v1  ;;  %v284_v8 = vmov 1.0   ;;  %v93_v20 = vld [vmem:[#allocation2] sm:$0xff] }
   0xe   :  { %v305_v2 = vshrl.u32 %v24_v0, 7 }
  0x10   :  { %v40_v3 = vadd.s32 120, %v305_v2  ;;  %v39_v4 = vadd.s32 112, %v305_v2  ;;  %v38_v5 = vadd.s32 104, %v305_v2  ;;  %v37_v7 = vadd.s32 96, %v305_v2 }
  0x11   :  { %v36_v9 = vadd.s32 88, %v305_v2  ;;  %v35_v10 = vadd.s32 80, %v305_v2  ;;  %v34_v11 = vadd.s32 72, %v305_v2  ;;  %v33_v12 = vadd.s32 64, %v305_v2 }
  0x12   :  { %vm60_vm1 = vcmp.eq.s32.totalorder %v40_v3, %v170_v6  ;;  %vm59_vm2 = vcmp.eq.s32.totalorder %v39_v4, %v170_v6  ;;  %vm58_vm3 = vcmp.eq.s32.totalorder %v38_v5, %v170_v6  ;;  %vm57_vm4 = vcmp.eq.s32.totalorder %v37_v7, %v170_v6 }
  0x13   :  { %221 = vmatpush3.msk.msra.mxu0 %vm60_vm1, %v284_v8  ;;  %vm56_vm5 = vcmp.eq.s32.totalorder %v36_v9, %v170_v6  ;;  %vm55_vm6 = vcmp.eq.s32.totalorder %v35_v10, %v170_v6  ;;  %vm54_vm7 = vcmp.eq.s32.totalorder %v34_v11, %v170_v6  ;;  %v32_v13 = vadd.s32 56, %v305_v2 }
  0x14   :  { %222 = vmatprep.subr.mxu0 %v282_v1  ;;  %vm53_vm8 = vcmp.eq.s32.totalorder %v33_v12, %v170_v6  ;;  %v31_v14 = vadd.s32 48, %v305_v2  ;;  %v30_v15 = vadd.s32 40, %v305_v2  ;;  %v29_v16 = vadd.s32 32, %v305_v2 }
  0x15   :  { %223 = vmatpush3.msk.msra.mxu0 %vm59_vm2, %v284_v8  ;;  %vm52_vm9 = vcmp.eq.s32.totalorder %v32_v13, %v170_v6  ;;  %v28_v17 = vadd.s32 24, %v305_v2  ;;  %v27_v18 = vadd.s32 16, %v305_v2  ;;  %v26_v19 = vadd.s32 8, %v305_v2 }
  0x16   :  { %224 = vmatprep.subr.mxu0 %v282_v1  ;;  %vm51_vm10 = vcmp.eq.s32.totalorder %v31_v14, %v170_v6  ;;  %vm50_vm11 = vcmp.eq.s32.totalorder %v30_v15, %v170_v6  ;;  %vm49_vm12 = vcmp.eq.s32.totalorder %v29_v16, %v170_v6  ;;  %vm45_vm0 = vcmp.eq.s32.totalorder %v305_v2, %v170_v6 }
  0x17   :  { %225 = vmatpush3.msk.msra.mxu0 %vm58_vm3, %v284_v8  ;;  %vm48_vm13 = vcmp.eq.s32.totalorder %v28_v17, %v170_v6  ;;  %vm47_vm14 = vcmp.eq.s32.totalorder %v27_v18, %v170_v6  ;;  %vm46_vm15 = vcmp.eq.s32.totalorder %v26_v19, %v170_v6 }
  0x18   :  { %226 = vmatprep.subr.mxu0 %v282_v1 }
  0x19   :  { %227 = vmatpush3.msk.msra.mxu0 %vm57_vm4, %v284_v8 }
  0x1a   :  { %228 = vmatprep.subr.mxu0 %v282_v1 }
  0x1b   :  { %229 = vmatpush3.msk.msra.mxu0 %vm56_vm5, %v284_v8 }
  0x1c   :  { %230 = vmatprep.subr.mxu0 %v282_v1 }
  0x1d   :  { %231 = vmatpush3.msk.msra.mxu0 %vm55_vm6, %v284_v8 }
  0x1e   :  { %232 = vmatprep.subr.mxu0 %v282_v1 }
  0x1f   :  { %233 = vmatpush3.msk.msra.mxu0 %vm54_vm7, %v284_v8 }
  0x20   :  { %234 = vmatprep.subr.mxu0 %v282_v1 }
  0x21   :  { %235 = vmatpush3.msk.msra.mxu0 %vm53_vm8, %v284_v8 }
  0x22   :  { %236 = vmatprep.subr.mxu0 %v282_v1 }
  0x23   :  { %237 = vmatpush3.msk.msra.mxu0 %vm52_vm9, %v284_v8 }
  0x24   :  { %238 = vmatprep.subr.mxu0 %v282_v1 }
  0x25   :  { %239 = vmatpush3.msk.msra.mxu0 %vm51_vm10, %v284_v8 }
  0x26   :  { %240 = vmatprep.subr.mxu0 %v282_v1 }
  0x27   :  { %241 = vmatpush3.msk.msra.mxu0 %vm50_vm11, %v284_v8 }
  0x28   :  { %242 = vmatprep.subr.mxu0 %v282_v1 }
  0x29   :  { %243 = vmatpush3.msk.msra.mxu0 %vm49_vm12, %v284_v8 }
  0x2a   :  { %244 = vmatprep.subr.mxu0 %v282_v1 }
  0x2b   :  { %245 = vmatpush3.msk.msra.mxu0 %vm48_vm13, %v284_v8 }
  0x2c   :  { %246 = vmatprep.subr.mxu0 %v282_v1 }
  0x2d   :  { %247 = vmatpush3.msk.msra.mxu0 %vm47_vm14, %v284_v8 }
  0x2e   :  { %248 = vmatprep.subr.mxu0 %v282_v1 }
  0x2f   :  { %249 = vmatpush3.msk.msra.mxu0 %vm46_vm15, %v284_v8 }
  0x30   :  { %250 = vmatprep.subr.mxu0 %v282_v1 }
  0x31   :  { %251 = vmatpush3.msk.msra.mxu0 %vm45_vm0, %v284_v8 }
  0x32   :  { %253 = vmatmul.mubr.f32.vlgmr.msra.gmra.mxu0 %v93_v20 }
  0xf2   :  { %v160_v21 = vpop.f32.mrf.mxu0 }
  0xf3   :  { %164 = vst [vmem:[%s346_s2] sm:$0xff] %v160_v21 }
  0xf4   :  { %v254_v22 = vpop.f32.mrf.mxu0 }
  0xf5   :  { %169 = vsyncpa [#allocation3], 1 }

</bundles_post_ra>
